<compile_context>
chip_gen: v5e
topology: v5e:2x2
jax: 0.10.0
libtpu: 0.0.40
codegen_flags: <defaults>
</compile_context>

<pallas_src>
import jax
import jax.numpy as jnp
from jax.experimental import pallas as pl
from jax.experimental.pallas import tpu as pltpu


_EPS_SQ = 1e-24  # (1e-12)^2 -> preserves F.normalize's max(||x||, eps) semantics


# ----------------------------- kernels ---------------------------------------


def _plain_kernel(x_ref, w_ref, o_ref):
    # x_ref: (TM, D) tile of rows; w_ref: (1, D) f32 weight (resident across the grid).
    x = x_ref[...].astype(jnp.float32)
    sumsq = jnp.sum(x * x, axis=-1, keepdims=True)        # XLU cross-lane reduce, (TM, 1)
    inv = jax.lax.rsqrt(jnp.maximum(sumsq, _EPS_SQ))      # EUP slot
    # Re-read x instead of keeping the f32 cast live across the reduction (load slots are
    # idle in this mem-bound kernel; trims live VMEM/vreg pressure).
    o_ref[...] = (x_ref[...].astype(jnp.float32) * inv * w_ref[...]).astype(o_ref.dtype)


def _packed_kernel(x_ref, w_ref, seg_ref, o_ref):
    # Lane-packed path: x_ref (TM, 128) holds P = 128 // D original rows per packed row.
    # w_ref: (1, 128) f32 weight tiled P times. seg_ref: (128, 128) f32 block-diagonal ones.
    x = x_ref[...].astype(jnp.float32)
    # Segmented sum of squares via one MXU matmul: lane j receives the sum over its own
    # D-wide segment, already broadcast back to every lane of that segment.
    segsum = jnp.dot(x * x, seg_ref[...], preferred_element_type=jnp.float32)  # (TM, 128)
    inv = jax.lax.rsqrt(jnp.maximum(segsum, _EPS_SQ))
    o_ref[...] = (x_ref[...].astype(jnp.float32) * inv * w_ref[...]).astype(o_ref.dtype)


# --------------------------- tiling helpers -----------------------------------


def _round_up(x, m):
    return -(-x // m) * m


def _tile_params():
    """(target_tile_bytes, vmem_budget_bytes). Conservative (fits v5e's 16 MiB scoped-VMEM
    default) unless a v6e/v7x device is positively detected."""
    kind = ""
    try:
        kind = jax.devices()[0].device_kind.lower()
    except Exception:
        pass
    if ("v6" in kind) or ("v7" in kind):
        return 4 << 20, 24 << 20   # 32 MiB scoped default; bigger tiles help v7x's 3.2 TB/s HBM
    return 2 << 20, 12 << 20


def _choose_tm(n_rows, d, itemsize, *, target_tile_bytes, vmem_budget_bytes):
    """Rows per tile (on the possibly lane-packed layout): dtype-aware size, dtype-aware
    row alignment, and >= 2 grid steps so v7x megacore gets both TensorCores working."""
    row_align = max(8, 32 // itemsize)   # 8 for f32, 16 for bf16, 32 for int8/fp8
    if n_rows <= row_align:
        return n_rows                     # single tile; block == full array is legal
    # Size in/out tiles by the actual element size...
    rows = max(row_align, (target_tile_bytes // (itemsize * d)) // row_align * row_align)
    # ...but budget VMEM for 2x in + 2x out (double-buffered, itemsize) + ~1 f32 intermediate.
    per_row_bytes = d * (4 * itemsize + 4)
    while rows > row_align and rows * per_row_bytes > vmem_budget_bytes:
        rows = max(row_align, (rows // 2) // row_align * row_align)
    # Cap so the grid has at least 2 steps (balanced halves, aligned): lets
    # dimension_semantics=("parallel",) shard rows across both v7x TensorCores.
    two_step_cap = _round_up(_round_up(n_rows, 2) // 2, row_align)
    return min(rows, two_step_cap)


# ------------------------------ wrapper ---------------------------------------


def normalize_scale(x, weight, *, tm=None):
    """Pallas equivalent of Normalize_Scale.forward: F.normalize(x, p=2, dim=1) * weight."""
    N, D = x.shape
    w32 = jnp.asarray(weight, dtype=jnp.float32).reshape(1, D)  # cast once, stays resident
    itemsize = jnp.dtype(x.dtype).itemsize
    target_tile_bytes, vmem_budget_bytes = _tile_params()

    use_packed = (D < 128) and (128 % D == 0)
    # TODO(synk): D < 128 with 128 % D != 0 could still be lane-packed via an lcm(D,128)-wide
    # layout; such shapes fall back to the plain (masked-store, partial-lane) path below.

    if use_packed:
        P = 128 // D
        # Pad rows to a multiple of P (required by the reshape); keep at least 8 packed rows
        # so the in-kernel matmul M dimension is never tiny. Padded rows are zeros -> rsqrt
        # stays finite -> padded outputs are zeros and get sliced off.
        n_rows = max(-(-N // P), 8)
        pad = n_rows * P - N
        # TODO(synk): when N % P != 0 the jnp.pad below costs one extra HBM pass over x; a
        # plain-kernel tail for the last N % P rows would avoid it.
        x_p = jnp.pad(x, ((0, pad), (0, 0))) if pad else x
        x_p = x_p.reshape(n_rows, 128)              # free row-major reshape -> lane-dense
        w_packed = jnp.tile(w32, (1, P))            # (1, 128), resident
        lane = jnp.arange(128, dtype=jnp.int32)
        seg = (lane[:, None] // D == lane[None, :] // D).astype(jnp.float32)  # (128, 128)

        if tm is None:
            tm = _choose_tm(n_rows, 128, itemsize,
                            target_tile_bytes=target_tile_bytes,
                            vmem_budget_bytes=vmem_budget_bytes)
        assert tm == n_rows or tm % 8 == 0, "tm must be a multiple of 8 (or equal n_rows)"

        out_p = pl.pallas_call(
            _packed_kernel,
            out_shape=jax.ShapeDtypeStruct((n_rows, 128), x.dtype),
            grid_spec=pltpu.PrefetchScalarGridSpec(
                num_scalar_prefetch=0,
                grid=(pl.cdiv(n_rows, tm),),
                in_specs=[
                    pl.BlockSpec((tm, 128), lambda i: (i, 0)),    # packed row tiles, pipelined
                    pl.BlockSpec((1, 128), lambda i: (0, 0)),     # weight: constant -> resident
                    pl.BlockSpec((128, 128), lambda i: (0, 0)),   # segment matrix: resident
                ],
                out_specs=pl.BlockSpec((tm, 128), lambda i: (i, 0)),  # lane-dense stores
            ),
            compiler_params=pltpu.CompilerParams(
                dimension_semantics=("parallel",),
            ),
        )(x_p, w_packed, seg)
        return out_p.reshape(n_rows * P, D)[:N]

    # Plain path: D is already lane-dense (D % 128 == 0) or an irregular D (still correct,
    # just partial lane occupancy / masked stores).
    if tm is None:
        tm = _choose_tm(N, D, itemsize,
                        target_tile_bytes=target_tile_bytes,
                        vmem_budget_bytes=vmem_budget_bytes)
    assert tm == N or tm % 8 == 0, "tm must be a multiple of 8 (or equal to N)"

    return pl.pallas_call(
        _plain_kernel,
        out_shape=jax.ShapeDtypeStruct((N, D), x.dtype),
        grid_spec=pltpu.PrefetchScalarGridSpec(
            num_scalar_prefetch=0,
            grid=(pl.cdiv(N, tm),),
            in_specs=[
                pl.BlockSpec((tm, D), lambda i: (i, 0)),   # row tiles, pipelined
                pl.BlockSpec((1, D), lambda i: (0, 0)),    # weight: constant -> resident
            ],
            out_specs=pl.BlockSpec((tm, D), lambda i: (i, 0)),
        ),
        compiler_params=pltpu.CompilerParams(
            dimension_semantics=("parallel",),
        ),
    )(x, w32)


# ------------------------------ reference / test -------------------------------


def _reference(x, weight):
    x32 = x.astype(jnp.float32)
    norm = jnp.maximum(jnp.sqrt(jnp.sum(x32 * x32, axis=1, keepdims=True)), 1e-12)
    return ((x32 / norm) * weight.astype(jnp.float32)).astype(x.dtype)


if __name__ == "__main__":
    key = jax.random.PRNGKey(0)
    init_norm = 20.0
    k1, k2, k3, k4 = jax.random.split(key, 4)

    # Case 1: typical module shape (small feature dim) -> lane-packed path, single tile.
    N, D = 8, 32
    x = jax.random.normal(k1, (N, D), dtype=jnp.float32)
    w = jnp.ones((1, D), dtype=jnp.float32) * init_norm   # nn.Parameter(ones(1,dim)*init_norm)
    out = jax.block_until_ready(normalize_scale(x, w))
    assert out.shape == (N, D)
    assert jnp.allclose(out, _reference(x, w), atol=1e-5, rtol=1e-5), "mismatch (case 1)"

    # Case 2: packed path with N not a multiple of the packing factor + multi-tile grid.
    N2, D2 = 50, 32
    x2 = jax.random.normal(k2, (N2, D2), dtype=jnp.float32)
    w2 = jnp.ones((1, D2), dtype=jnp.float32) * init_norm
    out2 = jax.block_until_ready(normalize_scale(x2, w2))
    assert out2.shape == (N2, D2)
    assert jnp.allclose(out2, _reference(x2, w2), atol=1e-5, rtol=1e-5), "mismatch (case 2)"

    # Case 3: lane-dense D (plain path), multi-tile grid.
    N3, D3 = 64, 128
    x3 = jax.random.normal(k3, (N3, D3), dtype=jnp.float32)
    w3 = jnp.ones((1, D3), dtype=jnp.float32) * init_norm
    out3 = jax.block_until_ready(normalize_scale(x3, w3))
    assert jnp.allclose(out3, _reference(x3, w3), atol=1e-5, rtol=1e-5), "mismatch (case 3)"

    # Case 4: bf16 input (exercises the 16-row alignment / dtype-aware tiling path).
    N4, D4 = 32, 256
    x4 = jax.random.normal(k4, (N4, D4), dtype=jnp.float32).astype(jnp.bfloat16)
    w4 = jnp.ones((1, D4), dtype=jnp.float32) * init_norm
    out4 = jax.block_until_ready(normalize_scale(x4, w4))
    ref4 = _reference(x4, w4)
    assert jnp.allclose(out4.astype(jnp.float32), ref4.astype(jnp.float32),
                        atol=0.25, rtol=0.02), "mismatch (case 4)"

    print("KERNEL_OK")
</pallas_src>

<mosaic_0001>
module attributes {stable_mosaic.version = 11 : i64} {
  func.func @_packed_kernel(%arg0: i32, %arg1: memref<8x128xf32, #tpu.memory_space<vmem>>, %arg2: memref<1x128xf32, #tpu.memory_space<vmem>>, %arg3: memref<128x128xf32, #tpu.memory_space<vmem>>, %arg4: memref<8x128xf32, #tpu.memory_space<vmem>>) attributes {dimension_semantics = [#tpu.dimension_semantics<parallel>], iteration_bounds = array<i64: 1>, scalar_prefetch = 0 : i64, scratch_operands = 0 : i64, tpu.core_type = #tpu.core_type<tc>, window_params = [{transform_indices = @transform_0, window_bounds = array<i64: 8, 128>}, {pipeline_mode = #tpu.pipeline_mode<synchronous>, transform_indices = @transform_1, window_bounds = array<i64: 1, 128>}, {pipeline_mode = #tpu.pipeline_mode<synchronous>, transform_indices = @transform_2, window_bounds = array<i64: 128, 128>}, {transform_indices = @transform_3, window_bounds = array<i64: 8, 128>}]} {
    %c0 = arith.constant 0 : index
    %c0_0 = arith.constant 0 : index
    %0 = vector.load %arg1[%c0, %c0_0] : memref<8x128xf32, #tpu.memory_space<vmem>>, vector<8x128xf32>
    %1 = arith.mulf %0, %0 : vector<8x128xf32>
    %c0_1 = arith.constant 0 : index
    %c0_2 = arith.constant 0 : index
    %2 = vector.load %arg3[%c0_1, %c0_2] : memref<128x128xf32, #tpu.memory_space<vmem>>, vector<128x128xf32>
    %cst = arith.constant dense<0.000000e+00> : vector<8x128xf32>
    %3 = tpu.matmul %1, %2, %cst {dimension_numbers = #tpu.dot_dimension_numbers<[1], [0], [0], [1], [0, 0, 1, 1], [], []>} : vector<8x128xf32>, vector<128x128xf32>, vector<8x128xf32> -> vector<8x128xf32>
    %cst_3 = arith.constant 1.000000e-24 : f32
    %4 = vector.broadcast %cst_3 : f32 to vector<8x128xf32>
    %5 = arith.maximumf %3, %4 : vector<8x128xf32>
    %6 = math.rsqrt %5 : vector<8x128xf32>
    %c0_4 = arith.constant 0 : index
    %c0_5 = arith.constant 0 : index
    %7 = vector.load %arg1[%c0_4, %c0_5] : memref<8x128xf32, #tpu.memory_space<vmem>>, vector<8x128xf32>
    %8 = arith.mulf %7, %6 : vector<8x128xf32>
    %c0_6 = arith.constant 0 : index
    %c0_7 = arith.constant 0 : index
    %9 = vector.load %arg2[%c0_6, %c0_7] : memref<1x128xf32, #tpu.memory_space<vmem>>, vector<1x128xf32>
    %10 = vector.broadcast %9 : vector<1x128xf32> to vector<8x128xf32>
    %11 = arith.mulf %8, %10 : vector<8x128xf32>
    %c0_8 = arith.constant 0 : index
    %c0_9 = arith.constant 0 : index
    %12 = vector.load %arg4[%c0_8, %c0_9] : memref<8x128xf32, #tpu.memory_space<vmem>>, vector<8x128xf32>
    tpu.vector_store %arg4[%c0_8, %c0_9], %11 {strides = array<i32>} : memref<8x128xf32, #tpu.memory_space<vmem>>, vector<8x128xf32>,
    return
  }
  func.func @transform_0(%arg0: i32) -> (i32, i32) {
    %c0_i32 = arith.constant 0 : i32
    %c0_i32_0 = arith.constant 0 : i32
    return %arg0, %c0_i32 : i32, i32
  }
  func.func @transform_1(%arg0: i32) -> (i32, i32) {
    %c0_i32 = arith.constant 0 : i32
    %c0_i32_0 = arith.constant 0 : i32
    %c0_i32_1 = arith.constant 0 : i32
    return %c0_i32, %c0_i32_0 : i32, i32
  }
  func.func @transform_2(%arg0: i32) -> (i32, i32) {
    %c0_i32 = arith.constant 0 : i32
    %c0_i32_0 = arith.constant 0 : i32
    %c0_i32_1 = arith.constant 0 : i32
    return %c0_i32, %c0_i32_0 : i32, i32
  }
  func.func @transform_3(%arg0: i32) -> (i32, i32) {
    %c0_i32 = arith.constant 0 : i32
    %c0_i32_0 = arith.constant 0 : i32
    return %arg0, %c0_i32 : i32, i32
  }
}

</mosaic_0001>

<bundles_post_ra>
// kernel: tpu_custom_call.1
= control target key start
LH: loop header
LB: loop body
LE: loop exit
PB: predicated region body
PF: predicated region fallthrough
CT: control target
= control target key end

     0   :  { %8 = vsyncpa [#allocation3], 0  ;;  %s281_s0 = inlined_call_operand.hbm [shape: f32[8,128], index: 0, kind: input, shape index: {}]   ;;  %s282_s1 = inlined_call_operand.hbm [shape: f32[1,128], index: 1, kind: input, shape index: {}]   ;;  %s283_s2 = inlined_call_operand.hbm [shape: f32[128,128], index: 2, kind: input, shape index: {}]   ;;  %s284_s3 = inlined_call_operand.hbm [shape: f32[8,128], index: 3, kind: output, shape index: {}]  }
   0x1   :  { %9 = vsyncpa [#allocation6], 0  ;;  %s27_s14 = sshll.u32 %s282_s1, 4  ;;  %s28_s14 = int_to_ptr.hbm [resolvable:$true] %s27_s14 }
   0x2   :  { %10 = vsyncpa [#allocation4], 0  ;;  %s243_s15 = smov [#allocation5]   ;;  %s16_s19 = sshll.u32 %s281_s0, 4  ;;  %s17_s19 = int_to_ptr.hbm [resolvable:$true] %s16_s19 }
   0x3   :  { %s29_s16 = sshll.u32 %s243_s15, 4  ;;  %s244_s20 = smov [#allocation2]   ;;  %s30_s16 = int_to_ptr.vmem [resolvable:$true] %s29_s16 }
   0x4   :  { %32 = dma.hbm_to_vmem [thread:$0]  %s28_s14, 16, %s30_s16, [#allocation6]  }
   0x5   :  { %s18_s21 = sshll.u32 %s244_s20, 4  ;;  %s37_s24 = sshll.u32 %s283_s2, 4  ;;  %s19_s21 = int_to_ptr.vmem [resolvable:$true] %s18_s21  ;;  %s38_s24 = int_to_ptr.hbm [resolvable:$true] %s37_s24 }
   0x6   :  { %21 = dma.hbm_to_vmem [thread:$0]  %s17_s19, 128, %s19_s21, [#allocation3]  }
   0x7   :  { %s245_s1 = smov [#allocation7]   ;;  %s246_s26 = smov 128  }
   0x8   :  { %s39_s25 = sshll.u32 %s245_s1, 4  ;;  %s247_s27 = smov 8   ;;  %s40_s25 = int_to_ptr.vmem [resolvable:$true] %s39_s25 }
   0x9   :  { %45 = dma.hbm_to_vmem [thread:$0]  %s38_s24, 2048, %s40_s25, [#allocation6], %s246_s26, %s246_s26, %s247_s27  }
   0xa   :  { %237 = dma.done.wait [#allocation3], 128  }
   0xb   :  { %238 = vsyncadd [#allocation3], 4294967168 }
   0xc   :  { %239 = dma.done.wait [#allocation6], 2064  }
   0xd   :  { %240 = vsyncadd [#allocation6], 4294965232  ;;  %v75_v0 = vld [vmem:[#allocation7 + $0x78] sm:$0xff]  ;;  %v74_v1 = vld [vmem:[#allocation7 + $0x70] sm:$0xff]  ;;  %s248_s0 = smov [#allocation8]   ;;  %s121_s30 = sshll.u32 %s284_s3, 4  ;;  %s122_s30 = int_to_ptr.hbm [resolvable:$true] %s121_s30 }
   0xe   :  { %76 = vmatpush.msra.mxu0 %v75_v0  ;;  %v73_v2 = vld [vmem:[#allocation7 + $0x68] sm:$0xff]  ;;  %v72_v3 = vld [vmem:[#allocation7 + $0x60] sm:$0xff]  ;;  %v71_v4 = vld [vmem:[#allocation7 + $0x58] sm:$0xff]  ;;  %s119_s2 = sshll.u32 %s248_s0, 4  ;;  %s120_s2 = int_to_ptr.vmem [resolvable:$true] %s119_s2 }
   0xf   :  { %v70_v5 = vld [vmem:[#allocation7 + $0x50] sm:$0xff]  ;;  %v69_v6 = vld [vmem:[#allocation7 + $0x48] sm:$0xff]  ;;  %v68_v7 = vld [vmem:[#allocation7 + $0x40] sm:$0xff] }
  0x10   :  { %77 = vmatpush.msra.mxu0 %v74_v1  ;;  %v67_v8 = vld [vmem:[#allocation7 + $0x38] sm:$0xff]  ;;  %v66_v9 = vld [vmem:[#allocation7 + $0x30] sm:$0xff]  ;;  %v65_v10 = vld [vmem:[#allocation7 + $0x28] sm:$0xff] }
  0x11   :  { %v64_v11 = vld [vmem:[#allocation7 + $0x20] sm:$0xff]  ;;  %v63_v12 = vld [vmem:[#allocation7 + $0x18] sm:$0xff]  ;;  %v62_v13 = vld [vmem:[#allocation7 + $0x10] sm:$0xff] }
  0x12   :  { %78 = vmatpush.msra.mxu0 %v73_v2  ;;  %v58_v14 = vld [vmem:[#allocation2] sm:$0xff]  ;;  %v61_v15 = vld [vmem:[#allocation7 + $0x8] sm:$0xff]  ;;  %v60_v16 = vld [vmem:[#allocation7] sm:$0xff] }
  0x13   :  { %v59_v17 = vmul.f32 %v58_v14, %v58_v14  ;;  %v138_v26 = vld [vmem:[#allocation5] ss:$0 sm:$0xff] }
  0x14   :  { %79 = vmatpush.msra.mxu0 %v72_v3 }
  0x16   :  { %80 = vmatpush.msra.mxu0 %v71_v4 }
  0x18   :  { %81 = vmatpush.msra.mxu0 %v70_v5 }
  0x1a   :  { %82 = vmatpush.msra.mxu0 %v69_v6 }
  0x1c   :  { %83 = vmatpush.msra.mxu0 %v68_v7 }
  0x1e   :  { %84 = vmatpush.msra.mxu0 %v67_v8 }
  0x20   :  { %85 = vmatpush.msra.mxu0 %v66_v9 }
  0x22   :  { %86 = vmatpush.msra.mxu0 %v65_v10 }
  0x24   :  { %87 = vmatpush.msra.mxu0 %v64_v11 }
  0x26   :  { %88 = vmatpush.msra.mxu0 %v63_v12 }
  0x28   :  { %89 = vmatpush.msra.mxu0 %v62_v13 }
  0x2a   :  { %90 = vmatpush.msra.mxu0 %v61_v15 }
  0x2c   :  { %91 = vmatpush.msra.mxu0 %v60_v16 }
  0x2d   :  { %92 = vmatmul.f32.vlgmr.msra.gmra.mxu0 %v59_v17 }
  0xaa   :  { %v93_v18 = vpop.f32.mrf.mxu0 }
  0xab   :  { %v96_v19 = vmax.f32 %v93_v18, 1e-24 }
  0xad   :  { %139 = vrsqrt.f32 %v96_v19  ;;  %vm103_vm1 = vweird.f32 %v96_v19 }
  0xb3   :  { %v140_v20 = vpop.eup %139 }
  0xb4   :  { %v98_v21 = vmul.f32 %v140_v20, %v96_v19  ;;  %vm104_vm0 = vweird.f32 %v140_v20 }
  0xb5   :  { %vm105_vm2 = vmor %vm103_vm1, %vm104_vm0 }
  0xb6   :  { %v99_v22 = vmul.f32 %v140_v20, %v98_v21 }
  0xb8   :  { %v100_v23 = vmul.f32 0.5, %v99_v22 }
  0xba   :  { %v101_v24 = vsub.f32 1.5, %v100_v23 }
  0xbc   :  { %v102_v25 = vmul.f32 %v140_v20, %v101_v24 }
  0xbe   :  { %v106_v27 = vsel %vm105_vm2, %v140_v20, %v102_v25 }
  0xbf   :  { %v107_v28 = vmul.f32 %v106_v27, %v58_v14 }
  0xc1   :  { %v112_v29 = vmul.f32 %v138_v26, %v107_v28 }
  0xc3   :  { %113 = vst [vmem:[#allocation8] sm:$0xff] %v112_v29 }
  0xc4   :  { %124 = dma.vmem_to_hbm [thread:$0]  %s120_s2, 128, %s122_s30, [#allocation4]  }
  0xc5   :  { %241 = dma.done.wait [#allocation4], 128  }
  0xc6   :  { %242 = vsyncadd [#allocation4], 4294967168 }
  0xc7   :  { %129 = vsyncpa [#allocation3], 1 }
  0xc8   :  { %130 = vsyncpa [#allocation6], 1 }
  0xc9   :  { %131 = vsyncpa [#allocation4], 1 }

</bundles_post_ra>
